<compile_context>
chip_gen: v7x
topology: tpu7x:2x2x1
jax: 0.10.0
libtpu: 0.0.40
codegen_flags: <defaults>
</compile_context>

<pallas_src>
import functools
import math

import jax
import jax.numpy as jnp
from jax import lax
from jax.experimental import pallas as pl
from jax.experimental.pallas import tpu as pltpu


def _embedding_gather_kernel(ids_ref, lut_hbm, o_ref, sem, *, token_block, scale):
    """Gather `token_block` embedding rows from HBM into o_ref and scale in place.

    ids_ref: (n_pad,) int32 token ids in SMEM (scalar prefetch).
    lut_hbm: (vocab, d_pad) float32 embedding table, left in HBM (pl.ANY).
    o_ref:   (token_block, d_pad) float32 output block in VMEM (gather target).
    sem:     single DMA semaphore shared by every row copy in this block.
    """
    vocab = lut_hbm.shape[0]
    base = pl.program_id(0) * token_block

    def issue(t, carry):
        tok = ids_ref[base + t]
        # Clamp so padded / out-of-range ids never produce an OOB DMA.
        tok = jnp.minimum(jnp.maximum(tok, 0), vocab - 1)
        pltpu.make_async_copy(
            lut_hbm.at[pl.ds(tok, 1), :],
            o_ref.at[pl.ds(t, 1), :],
            sem,
        ).start()
        return carry

    lax.fori_loop(0, token_block, issue, 0)

    # All row copies signal the same semaphore and have identical sizes, so
    # waiting `token_block` times with an identically-shaped descriptor blocks
    # until every gathered row has landed in the output block.
    def drain(t, carry):
        pltpu.make_async_copy(
            lut_hbm.at[pl.ds(0, 1), :],
            o_ref.at[pl.ds(0, 1), :],
            sem,
        ).wait()
        return carry

    lax.fori_loop(0, token_block, drain, 0)

    # Fused sqrt(d_model) scale, applied in place; single lane-dense store.
    o_ref[...] = (o_ref[...] * scale).astype(o_ref.dtype)


def embeddings_forward(x, lut, *, token_block=512):
    """x: (B, S) integer token ids; lut: (vocab, d_model) float32 table."""
    B, S = x.shape
    vocab, d_model = lut.shape
    scale = float(math.sqrt(d_model))

    n = B * S

    # Lane-dense output: pad d_model up to a multiple of 128 lanes.
    d_pad = pl.cdiv(d_model, 128) * 128
    lut_p = lut if d_pad == d_model else jnp.pad(
        lut, ((0, 0), (0, d_pad - d_model)))

    # Token block: multiple of 8 sublanes, clamped for tiny inputs and capped
    # so the double-buffered output block stays well within the VMEM budget
    # (~4 MiB per buffer).
    vmem_cap = max(8, (4 * 1024 * 1024) // (d_pad * 4))
    tb = min(int(token_block), pl.cdiv(n, 8) * 8, vmem_cap)
    tb = max(8, (tb // 8) * 8)
    n_pad = pl.cdiv(n, tb) * tb

    ids = x.reshape(-1).astype(jnp.int32)
    if n_pad != n:
        ids = jnp.pad(ids, (0, n_pad - n))   # pad id 0; rows sliced off below

    grid = (n_pad // tb,)

    kernel = functools.partial(_embedding_gather_kernel,
                               token_block=tb, scale=scale)

    bytes_rows = n_pad * d_pad * 4
    cost = pl.CostEstimate(
        flops=n_pad * d_pad,                        # fused scale multiply
        transcendentals=0,
        bytes_accessed=2 * bytes_rows + n_pad * 4,  # gathered reads + stores + ids
    )

    out = pl.pallas_call(
        kernel,
        out_shape=jax.ShapeDtypeStruct((n_pad, d_pad), jnp.float32),
        grid_spec=pltpu.PrefetchScalarGridSpec(
            num_scalar_prefetch=1,                       # ids -> SMEM
            grid=grid,
            in_specs=[pl.BlockSpec(memory_space=pl.ANY)],  # table stays in HBM
            out_specs=pl.BlockSpec((tb, d_pad), lambda i, ids: (i, 0)),
            scratch_shapes=[
                pltpu.SemaphoreType.DMA(()),             # shared row-DMA sem
            ],
        ),
        compiler_params=pltpu.CompilerParams(
            dimension_semantics=("parallel",)),  # shard token blocks over TCs
        cost_estimate=cost,
    )(ids, lut_p)

    if n_pad != n or d_pad != d_model:
        out = out[:n, :d_model]
    return out.reshape(B, S, d_model)


if __name__ == "__main__":
    key = jax.random.PRNGKey(0)
    k_tok, k_lut = jax.random.split(key)

    B, S = 2, 8
    vocab, d_model = 64, 32

    # Deterministic params: nn.Embedding default init is N(0, 1).
    lut = jax.random.normal(k_lut, (vocab, d_model), dtype=jnp.float32)
    x = jax.random.randint(k_tok, (B, S), 0, vocab, dtype=jnp.int32)

    out = embeddings_forward(x, lut)
    out = jax.block_until_ready(out)

    # Reference check against plain-JAX gather.
    ref = jnp.take(lut, x, axis=0) * math.sqrt(d_model)
    assert out.shape == (B, S, d_model)
    assert jnp.allclose(out, ref, atol=1e-5, rtol=1e-5), "mismatch vs reference"

    print("KERNEL_OK")
</pallas_src>

<mosaic_0001>
module attributes {stable_mosaic.version = 11 : i64} {
  func.func @_embedding_gather_kernel(%arg0: i32, %arg1: memref<16xi32, #tpu.memory_space<smem>>, %arg2: memref<64x128xf32, #tpu.memory_space<any>>, %arg3: memref<16x128xf32, #tpu.memory_space<vmem>>, %arg4: memref<!tpu.dma_semaphore, #tpu.memory_space<semaphore_mem>>) attributes {dimension_semantics = [#tpu.dimension_semantics<parallel>], iteration_bounds = array<i64: 1>, scalar_prefetch = 1 : i64, scratch_operands = 1 : i64, tpu.core_type = #tpu.core_type<tc>, window_params = [{}, {transform_indices = @transform_1, window_bounds = array<i64: 16, 128>}]} {
    %c16_i32 = arith.constant 16 : i32
    %0 = arith.muli %arg0, %c16_i32 : i32
    %c0_i32 = arith.constant 0 : i32
    %c16_i32_0 = arith.constant 16 : i32
    %1 = arith.addi %c0_i32, %c16_i32_0 : i32
    %c1_i32 = arith.constant 1 : i32
    scf.for %arg5 = %c0_i32 to %1 step %c1_i32  : i32 {
      %7 = arith.addi %0, %arg5 : i32
      %8 = arith.index_cast %7 : i32 to index
      %9 = memref.load %arg1[%8] : memref<16xi32, #tpu.memory_space<smem>>
      %c0_i32_8 = arith.constant 0 : i32
      %10 = arith.maxsi %9, %c0_i32_8 : i32
      %c63_i32 = arith.constant 63 : i32
      %11 = arith.minsi %10, %c63_i32 : i32
      %c0_i32_9 = arith.constant 0 : i32
      %12 = tpu.memref_slice %arg2[%11, %c0_i32_9] : memref<64x128xf32, #tpu.memory_space<any>> -> memref<1x128xf32, #tpu.memory_space<any>>
      %c0_i32_10 = arith.constant 0 : i32
      %13 = tpu.memref_slice %arg3[%arg5, %c0_i32_10] : memref<16x128xf32, #tpu.memory_space<vmem>> -> memref<1x128xf32, #tpu.memory_space<vmem>>
      tpu.enqueue_dma source(%12 : memref<1x128xf32, #tpu.memory_space<any>>) target(%13 : memref<1x128xf32, #tpu.memory_space<vmem>>) target_semaphore(%arg4 : memref<!tpu.dma_semaphore, #tpu.memory_space<semaphore_mem>>)
    }
    %c16_i32_1 = arith.constant 16 : i32
    %c0_i32_2 = arith.constant 0 : i32
    %c16_i32_3 = arith.constant 16 : i32
    %2 = arith.addi %c0_i32_2, %c16_i32_3 : i32
    %c1_i32_4 = arith.constant 1 : i32
    scf.for %arg5 = %c0_i32_2 to %2 step %c1_i32_4  : i32 {
      %c0_i32_8 = arith.constant 0 : i32
      %c0_i32_9 = arith.constant 0 : i32
      %7 = tpu.memref_slice %arg2[%c0_i32_8, %c0_i32_9] : memref<64x128xf32, #tpu.memory_space<any>> -> memref<1x128xf32, #tpu.memory_space<any>>
      %c0_i32_10 = arith.constant 0 : i32
      %c0_i32_11 = arith.constant 0 : i32
      %8 = tpu.memref_slice %arg3[%c0_i32_10, %c0_i32_11] : memref<16x128xf32, #tpu.memory_space<vmem>> -> memref<1x128xf32, #tpu.memory_space<vmem>>
      tpu.wait_dma2 semaphore(%arg4 : memref<!tpu.dma_semaphore, #tpu.memory_space<semaphore_mem>>) src(%7 : memref<1x128xf32, #tpu.memory_space<any>>) dst(%8 : memref<1x128xf32, #tpu.memory_space<vmem>>)
    }
    %c0 = arith.constant 0 : index
    %c0_5 = arith.constant 0 : index
    %3 = vector.load %arg3[%c0, %c0_5] : memref<16x128xf32, #tpu.memory_space<vmem>>, vector<16x128xf32>
    %cst = arith.constant 5.65685415 : f32
    %4 = vector.broadcast %cst : f32 to vector<16x128xf32>
    %5 = arith.mulf %3, %4 : vector<16x128xf32>
    %c0_6 = arith.constant 0 : index
    %c0_7 = arith.constant 0 : index
    %6 = vector.load %arg3[%c0_6, %c0_7] : memref<16x128xf32, #tpu.memory_space<vmem>>, vector<16x128xf32>
    tpu.vector_store %arg3[%c0_6, %c0_7], %5 {strides = array<i32>} : memref<16x128xf32, #tpu.memory_space<vmem>>, vector<16x128xf32>,
    return
  }
  func.func @transform_1(%arg0: i32, %arg1: memref<16xi32, #tpu.memory_space<smem>>) -> (i32, i32) {
    %c0_i32 = arith.constant 0 : i32
    %c0_i32_0 = arith.constant 0 : i32
    return %arg0, %c0_i32 : i32, i32
  }
}

</mosaic_0001>

<bundles_post_ra>
// kernel: tpu_custom_call.1
= control target key start
LH: loop header
LB: loop body
LE: loop exit
PB: predicated region body
PF: predicated region fallthrough
CT: control target
= control target key end

     0   :  { %s272_s0 = inlined_call_operand.hbm [shape: s32[16], index: 0, kind: input, shape index: {}]   ;;  %s273_s1 = inlined_call_operand.hbm [shape: f32[64,128], index: 1, kind: input, shape index: {}]   ;;  %s274_s2 = inlined_call_operand.hbm [shape: f32[16,128], index: 2, kind: output, shape index: {}]  }
   0x1   :  { %s118_s11 = scalar_lea.hbm %s272_s0, 16 }
   0x2   :  { %p119_p0 = scmp.ne.s32.totalorder %s272_s0, %s118_s11  ;;  %p122_p1 = scmp.lt.u32.totalorder %s118_s11, %s272_s0 }
   0x4   :  { %p124_p2 = pnand %p122_p1, %p119_p0 }
   0x6   :  { %127 = shalt.err (!%p124_p2)  }
   0x7   :  { %s196_s16 = smov [#allocation4]  }
   0x8   :  { %8 = dma.hbm_to_smem %s272_s0, 16, %s196_s16, [#allocation3] }
   0x9   :  { %182 = dma.done.wait [#allocation3], 16 }
   0xa   :  { %183 = vsyncadd [#allocation3], 4294967280 }
   0xb   :  { %10 = sfence }
   0xc   :  { %11 = vsyncpa [#allocation6], 0  ;;  %s227_s19 = smov 0  }
   0xd LB: > { %s20_s20 = sld [smem:[#allocation4 + %s190_s19]]  ;;  %s27_s21 = scalar_lea.vmem [#allocation5], %s190_s19  ;;  %s190_s19 = sphi %s227_s19, %s18_s19  }
   0xe   : > { %s35_s22 = sshll.u32 %s27_s21, 4  ;;  %s130_s29 = scalar_lea.hbm %s273_s1, 1024  ;;  %s36_s22 = int_to_ptr.vmem [resolvable:$true] %s35_s22 }
  0x13   : > { %p21_p3 = scmp.gt.s32.totalorder %s20_s20, 0  ;;  %p89_p4 = scmp.lt.s32.totalorder %s20_s20, 63 }
  0x15   : > { %s276_s20 = smov (!%p21_p3, %s20_s20), 0 }
  0x16   : > { %s278_s20 = smov (!%p89_p4, %s276_s20), 63 }
  0x17   : > { %s94_s0 = sshll.u32 %s278_s20, 4 }
  0x18   : > { %s26_s25 = scalar_lea.hbm %s273_s1, %s94_s0 }
  0x19   : > { %s128_s26 = scalar_lea.hbm %s26_s25, 16  ;;  %p131_p6 = scmp.lt.u32.totalorder %s26_s25, %s273_s1 }
  0x1a   : > { %p129_p5 = scmp.ne.s32.totalorder %s26_s25, %s128_s26  ;;  %p132_p7 = scmp.lt.u32.totalorder %s130_s29, %s128_s26 }
  0x1b   : > { %p134_p9 = scmp.lt.u32.totalorder %s128_s26, %s26_s25 }
  0x1c   : > { %p133_p8 = por %p132_p7, %p131_p6 }
  0x1e   : > { %p135_p10 = por %p134_p9, %p133_p8 }
  0x20   : > { %p136_p11 = pnand %p135_p10, %p129_p5 }
  0x22   : > { %139 = shalt.err (!%p136_p11)  }
  0x23   : > { %s140_s4 = scalar_lea.vmem %s36_s22, 16  ;;  %s197_s5 = smov [#allocation5]  }
  0x24   : > { %p141_p12 = scmp.ne.s32.totalorder %s36_s22, %s140_s4  ;;  %s142_s6 = sshll.u32 %s197_s5, 4  ;;  %s243_s6 = int_to_ptr.vmem [resolvable:$false] %s142_s6 }
  0x25   : > { %s246_s7 = scalar_lea.vmem %s243_s6, 256  ;;  %p145_p13 = scmp.lt.s32.totalorder %s36_s22, %s243_s6 }
  0x26   : > { %p146_p0 = scmp.lt.s32.totalorder %s246_s7, %s140_s4 }
  0x28   : > { %p147_p1 = por %p146_p0, %p145_p13 }
  0x2a   : > { %p148_p2 = pnand %p147_p1, %p141_p12 }
  0x2c   : > { %151 = shalt.err (!%p148_p2)  }
  0x2d   : > { %38 = dma.hbm_to_vmem [thread:$0]  %s26_s25, 16, %s36_s22, [#allocation2] }
  0x2e   : > { %s18_s19 = sadd.s32 1, %s190_s19  }
  0x2f   : > { %p15_p3 = scmp.ge.s32.totalorder %s18_s19, 16  }
  0x30   :  { %s192_s8 = smov (%p15_p3), 0  }
  0x31   :  { %17 = sbr.rel (!%p15_p3) target bundleno = 13 (0xd), region = 40 }
  0x38 LB: > { %184 = dma.done.wait [#allocation2], 16  ;;  %s194_s8 = sphi %s192_s8, %s44_s8  }
  0x39   : > { %185 = vsyncadd [#allocation2], 4294967280  ;;  %s44_s8 = sadd.s32 1, %s194_s8  }
  0x3a   : > { %p41_p4 = scmp.ge.s32.totalorder %s44_s8, 16  }
  0x3b   :  { %v48_v0 = vld [vmem:[#allocation5] sm:$0xff] (%p41_p4)  ;;  %v49_v1 = vld [vmem:[#allocation5 + $0x8] sm:$0xff] (%p41_p4)  ;;  %p153_p5 = scmp.ne.s32.totalorder (%p41_p4), %s243_s6, %s246_s7  ;;  %p157_p6 = scmp.lt.s32.totalorder (%p41_p4), %s243_s6, %s243_s6 }
  0x3c   :  { %43 = sbr.rel (!%p41_p4) target bundleno = 56 (0x38), region = 51  ;;  %v50_v2 = vmul.f32 (%p41_p4), 5.656854, %v48_v0  ;;  %v51_v3 = vmul.f32 (%p41_p4), 5.656854, %v49_v1  ;;  %p158_p7 = scmp.lt.s32.totalorder (%p41_p4), %s246_s7, %s246_s7 }
  0x3e   :  { %52 = vst [vmem:[#allocation5] sm:$0xff] (%p41_p4), %v50_v2  ;;  %53 = vst [vmem:[#allocation5 + $0x8] sm:$0xff] (%p41_p4), %v51_v3  ;;  %p159_p8 = por (%p41_p4), %p158_p7, %p157_p6 }
  0x40   :  { %p160_p9 = pnand (%p41_p4), %p159_p8, %p153_p5 }
  0x43   :  { %163 = shalt.err (!%p160_p9)
}
  0x44   :  { %s164_s10 = scalar_lea.hbm %s274_s2, 256 }
  0x45   :  { %p165_p10 = scmp.ne.s32.totalorder %s274_s2, %s164_s10  ;;  %p168_p11 = scmp.lt.u32.totalorder %s164_s10, %s274_s2 }
  0x47   :  { %p170_p12 = pnand %p168_p11, %p165_p10 }
  0x49   :  { %173 = shalt.err (!%p170_p12)
}
  0x4a   :  { %s198_s15 = smov 128   ;;  %s199_s16 = smov 8  }
  0x4b   :  { %65 = dma.vmem_to_hbm [thread:$0]  %s243_s6, 256, %s274_s2, [#allocation6], %s198_s15, %s198_s15, %s199_s16  }
  0x4c   :  { %186 = dma.done.wait [#allocation6], 256  }
  0x4d   :  { %187 = vsyncadd [#allocation6], 4294967040 }
  0x4e   :  { %69 = vsyncpa [#allocation6], 1 }
  0x4f   :  { %70 = vsyncmov [#allocation2] }
  0x52   :  { %s71_s19 = vpop.sfrf %70 }
  0x53   :  { %p95_p13 = scmp.ne.s32.totalorder %s71_s19, 0 }
  0x55   :  { %75 = shalt.err (%p95_p13)  }

</bundles_post_ra>
